<compile_context>
chip_gen: v5e
topology: v5e:2x2
jax: 0.10.0
libtpu: 0.0.40
codegen_flags: <defaults>
</compile_context>

<pallas_src>
import jax
import jax.numpy as jnp
from jax.experimental import pallas as pl
from jax.experimental.pallas import tpu as pltpu

DIM_IN = 5
HIDDEN = 100
DIM_OUT = 1

DIM_IN_PAD = 8       # sublane-aligned storage for W1 (kernel slices back to 5)
HIDDEN_PAD = 128     # lane-aligned hidden width
OUT_SUBLANES = 8     # sublane-aligned output slab; only row 0 carries real data
MAX_TILE_B = 2048    # batch rows per grid step (cap)


def _round_up(n, m):
    return ((n + m - 1) // m) * m


def _cdiv(a, b):
    return (a + b - 1) // b


def _pick_tile_b(B):
    """Rows per grid step: multiple of 128, capped at MAX_TILE_B, and chosen so
    batches > 128 rows produce >= 2 grid steps (lets dimension_semantics
    'parallel' shard the batch axis across both TensorCores on v7x)."""
    if B <= 128:
        return 128
    return min(MAX_TILE_B, _round_up(_cdiv(B, 2), 128))


def value_mlp_kernel(x_ref,
                     w1_ref, b1_ref,
                     w2_ref, b2_ref,
                     w3_ref, b3_ref,
                     w4_ref, b4_ref,
                     out_ref):
    """One batch tile of the fused MLP forward.  Padded weight rows/cols are
    explicit zeros, so the math is identical to the unpadded model."""
    x = x_ref[...]                                         # (TILE_B, 5) f32

    # Layer 1: (TILE_B,5) @ (5,128) + (1,128) -> tanh
    # W1 is stored (8,128) with explicit zero rows 5..7; slice back to K=5.
    w1 = w1_ref[:DIM_IN, :]
    h = jnp.tanh(
        jnp.dot(x, w1, preferred_element_type=jnp.float32) + b1_ref[...]
    )
    # Layer 2: (TILE_B,128) @ (128,128) + (1,128) -> tanh
    h = jnp.tanh(
        jnp.dot(h, w2_ref[...], preferred_element_type=jnp.float32) + b2_ref[...]
    )
    # Layer 3: (TILE_B,128) @ (128,128) + (1,128) -> tanh
    h = jnp.tanh(
        jnp.dot(h, w3_ref[...], preferred_element_type=jnp.float32) + b3_ref[...]
    )
    # Output layer: contract the hidden dim of h against W4's single real
    # output column (kept as a (1,128) row) -> lane-dense (1, TILE_B) row.
    y_row = jax.lax.dot_general(
        w4_ref[...], h,
        dimension_numbers=(((1,), (1,)), ((), ())),
        preferred_element_type=jnp.float32)                # (1, TILE_B)
    y_row = y_row + b4_ref[0]                              # scalar bias (SMEM)
    # Store as a full (8, TILE_B) sublane-aligned, lane-dense slab (unmasked
    # vector stores); only sublane 0 is consumed by the wrapper.
    out_ref[...] = jnp.broadcast_to(y_row, (OUT_SUBLANES, y_row.shape[1]))


def _pad_params(params):
    """Zero-pad (in, out)-layout params to aligned shapes (one time)."""
    (w1, b1), (w2, b2), (w3, b3), (w4, b4) = params

    def pad2(a, rows, cols):
        out = jnp.zeros((rows, cols), jnp.float32)
        return out.at[: a.shape[0], : a.shape[1]].set(a.astype(jnp.float32))

    w1p = pad2(w1, DIM_IN_PAD, HIDDEN_PAD)     # (8, 128), rows 5..7 zero
    w2p = pad2(w2, HIDDEN_PAD, HIDDEN_PAD)     # (128, 128)
    w3p = pad2(w3, HIDDEN_PAD, HIDDEN_PAD)     # (128, 128)
    w4p = pad2(w4.T, 1, HIDDEN_PAD)            # (1, 128): W4[:, 0] as a row
    b1p = pad2(b1, 1, HIDDEN_PAD)
    b2p = pad2(b2, 1, HIDDEN_PAD)
    b3p = pad2(b3, 1, HIDDEN_PAD)
    b4p = jnp.reshape(b4, (-1,)).astype(jnp.float32)       # (1,) scalar -> SMEM
    return w1p, b1p, w2p, b2p, w3p, b3p, w4p, b4p


def value_model_forward(x, params, *, tile_b=None):
    """x: (B, 5) f32 -> (B, 1) f32.  Gridded over the batch dimension."""
    B = x.shape[0]
    if tile_b is None:
        tile_b = _pick_tile_b(B)
    assert tile_b % 128 == 0
    num_tiles = _cdiv(B, tile_b)
    b_pad = num_tiles * tile_b

    x = x.astype(jnp.float32)
    # No feature padding and no batch padding for B >= tile_b: the ragged last
    # block is handled by Pallas and its rows never mix with real rows.
    if B < tile_b:  # only tiny batches (< 128 rows): keep the single block in-bounds
        x = jnp.pad(x, ((0, tile_b - B), (0, 0)))

    w1p, b1p, w2p, b2p, w3p, b3p, w4p, b4p = _pad_params(params)

    def resident(shape):
        # Full-array block, always block (0, 0): stays VMEM-resident across steps.
        # TODO(synk): pipeline_mode=pl.Buffered(1) would drop the unused second
        # buffer for these constant operands; left at the default conservatively.
        return pl.BlockSpec(shape, lambda i: (0, 0))

    in_specs = [
        pl.BlockSpec((tile_b, DIM_IN), lambda i: (i, 0)),   # x tile (ragged ok)
        resident((DIM_IN_PAD, HIDDEN_PAD)),                 # w1
        resident((1, HIDDEN_PAD)),                          # b1
        resident((HIDDEN_PAD, HIDDEN_PAD)),                 # w2
        resident((1, HIDDEN_PAD)),                          # b2
        resident((HIDDEN_PAD, HIDDEN_PAD)),                 # w3
        resident((1, HIDDEN_PAD)),                          # b3
        resident((1, HIDDEN_PAD)),                          # w4 (single column, as a row)
        pl.BlockSpec(memory_space=pltpu.MemorySpace.SMEM),  # b4 scalar
    ]
    # Lane-dense output: each grid step writes an aligned (8, tile_b) slab of an
    # (8, b_pad) array; only sublane 0 carries the real values.
    out_spec = pl.BlockSpec((OUT_SUBLANES, tile_b), lambda i: (0, i))

    flops = 2 * b_pad * (DIM_IN * HIDDEN_PAD
                         + 2 * HIDDEN_PAD * HIDDEN_PAD
                         + HIDDEN_PAD * DIM_OUT)
    transcendentals = 3 * HIDDEN_PAD * b_pad
    bytes_accessed = 4 * (b_pad * DIM_IN + OUT_SUBLANES * b_pad
                          + w1p.size + w2p.size + w3p.size + w4p.size
                          + b1p.size + b2p.size + b3p.size + b4p.size)
    cost = pl.CostEstimate(flops=flops, transcendentals=transcendentals,
                           bytes_accessed=bytes_accessed)

    out_slab = pl.pallas_call(
        value_mlp_kernel,
        out_shape=jax.ShapeDtypeStruct((OUT_SUBLANES, b_pad), jnp.float32),
        grid=(num_tiles,),
        in_specs=in_specs,
        out_specs=out_spec,
        compiler_params=pltpu.CompilerParams(
            dimension_semantics=("parallel",),     # megacore-shardable on v7x
            vmem_limit_bytes=32 * 1024 * 1024,     # ample for tile_b=2048 (<~4 MiB live)
        ),
        cost_estimate=cost,
    )(x, w1p, b1p, w2p, b2p, w3p, b3p, w4p, b4p)

    # Row 0 holds the real values; trailing ragged-block rows are garbage and dropped.
    return out_slab[0, :B].reshape(B, DIM_OUT)


def init_params(key, dim_states=DIM_IN, hidden=(HIDDEN, HIDDEN, HIDDEN),
                dim_out=DIM_OUT):
    """Mirror the PyTorch module's init: Linear weights ~ N(0, 1);
    biases at PyTorch's default U(-1/sqrt(fan_in), 1/sqrt(fan_in)).
    Weights stored as (in, out) so the kernel computes x @ W directly."""
    sizes = [dim_states, *hidden, dim_out]
    params = []
    for i in range(len(sizes) - 1):
        fan_in, fan_out = sizes[i], sizes[i + 1]
        key, kw, kb = jax.random.split(key, 3)
        w = jax.random.normal(kw, (fan_in, fan_out), dtype=jnp.float32)
        bound = 1.0 / jnp.sqrt(jnp.float32(fan_in))
        b = jax.random.uniform(kb, (1, fan_out), dtype=jnp.float32,
                               minval=-bound, maxval=bound)
        params.append((w, b))
    return params


def reference_forward(x, params):
    """Pure-JAX reference (same math as the PyTorch MLP)."""
    (w1, b1), (w2, b2), (w3, b3), (w4, b4) = params
    h = jnp.tanh(x @ w1 + b1)
    h = jnp.tanh(h @ w2 + b2)
    h = jnp.tanh(h @ w3 + b3)
    return h @ w4 + b4


if __name__ == "__main__":
    key = jax.random.PRNGKey(0)
    k_x, k_p = jax.random.split(key)

    params = init_params(k_p)

    # Small batch (single tile).
    B = 8
    x = jax.random.normal(k_x, (B, DIM_IN), dtype=jnp.float32)
    out = jax.block_until_ready(value_model_forward(x, params))
    ref = reference_forward(x, params)
    assert out.shape == (B, DIM_OUT), out.shape
    assert jnp.allclose(out, ref, atol=1e-4, rtol=1e-4), (out, ref)

    # Ragged, multi-tile batch path (2 grid steps, partial last block).
    B2 = 300
    x2 = jax.random.normal(k_x, (B2, DIM_IN), dtype=jnp.float32)
    out2 = jax.block_until_ready(value_model_forward(x2, params))
    ref2 = reference_forward(x2, params)
    assert out2.shape == (B2, DIM_OUT), out2.shape
    assert jnp.allclose(out2, ref2, atol=1e-4, rtol=1e-4)

    print("KERNEL_OK")
</pallas_src>

<mosaic_0001>
module attributes {stable_mosaic.version = 11 : i64} {
  func.func @value_mlp_kernel(%arg0: i32, %arg1: memref<128x5xf32, #tpu.memory_space<vmem>>, %arg2: memref<8x128xf32, #tpu.memory_space<vmem>>, %arg3: memref<1x128xf32, #tpu.memory_space<vmem>>, %arg4: memref<128x128xf32, #tpu.memory_space<vmem>>, %arg5: memref<1x128xf32, #tpu.memory_space<vmem>>, %arg6: memref<128x128xf32, #tpu.memory_space<vmem>>, %arg7: memref<1x128xf32, #tpu.memory_space<vmem>>, %arg8: memref<1x128xf32, #tpu.memory_space<vmem>>, %arg9: memref<1xf32, #tpu.memory_space<smem>>, %arg10: memref<8x128xf32, #tpu.memory_space<vmem>>) attributes {dimension_semantics = [#tpu.dimension_semantics<parallel>], iteration_bounds = array<i64: 1>, scalar_prefetch = 0 : i64, scratch_operands = 0 : i64, tpu.core_type = #tpu.core_type<tc>, window_params = [{transform_indices = @transform_0, window_bounds = array<i64: 128, 5>}, {pipeline_mode = #tpu.pipeline_mode<synchronous>, transform_indices = @transform_1, window_bounds = array<i64: 8, 128>}, {pipeline_mode = #tpu.pipeline_mode<synchronous>, transform_indices = @transform_2, window_bounds = array<i64: 1, 128>}, {pipeline_mode = #tpu.pipeline_mode<synchronous>, transform_indices = @transform_3, window_bounds = array<i64: 128, 128>}, {pipeline_mode = #tpu.pipeline_mode<synchronous>, transform_indices = @transform_4, window_bounds = array<i64: 1, 128>}, {pipeline_mode = #tpu.pipeline_mode<synchronous>, transform_indices = @transform_5, window_bounds = array<i64: 128, 128>}, {pipeline_mode = #tpu.pipeline_mode<synchronous>, transform_indices = @transform_6, window_bounds = array<i64: 1, 128>}, {pipeline_mode = #tpu.pipeline_mode<synchronous>, transform_indices = @transform_7, window_bounds = array<i64: 1, 128>}, {transform_indices = @transform_8, window_bounds = array<i64: 1>}, {transform_indices = @transform_9, window_bounds = array<i64: 8, 128>}]} {
    %c0 = arith.constant 0 : index
    %c0_0 = arith.constant 0 : index
    %0 = vector.load %arg1[%c0, %c0_0] : memref<128x5xf32, #tpu.memory_space<vmem>>, vector<128x5xf32>
    %c0_1 = arith.constant 0 : index
    %c0_2 = arith.constant 0 : index
    %1 = vector.load %arg2[%c0_1, %c0_2] : memref<8x128xf32, #tpu.memory_space<vmem>>, vector<5x128xf32>
    %cst = arith.constant dense<0.000000e+00> : vector<128x128xf32>
    %2 = tpu.matmul %0, %1, %cst {dimension_numbers = #tpu.dot_dimension_numbers<[1], [0], [0], [1], [0, 0, 1, 1], [], []>} : vector<128x5xf32>, vector<5x128xf32>, vector<128x128xf32> -> vector<128x128xf32>
    %c0_3 = arith.constant 0 : index
    %c0_4 = arith.constant 0 : index
    %3 = vector.load %arg3[%c0_3, %c0_4] : memref<1x128xf32, #tpu.memory_space<vmem>>, vector<1x128xf32>
    %4 = vector.broadcast %3 : vector<1x128xf32> to vector<128x128xf32>
    %5 = arith.addf %2, %4 : vector<128x128xf32>
    %6 = math.tanh %5 : vector<128x128xf32>
    %c0_5 = arith.constant 0 : index
    %c0_6 = arith.constant 0 : index
    %7 = vector.load %arg4[%c0_5, %c0_6] : memref<128x128xf32, #tpu.memory_space<vmem>>, vector<128x128xf32>
    %cst_7 = arith.constant dense<0.000000e+00> : vector<128x128xf32>
    %8 = tpu.matmul %6, %7, %cst_7 {dimension_numbers = #tpu.dot_dimension_numbers<[1], [0], [0], [1], [0, 0, 1, 1], [], []>} : vector<128x128xf32>, vector<128x128xf32>, vector<128x128xf32> -> vector<128x128xf32>
    %c0_8 = arith.constant 0 : index
    %c0_9 = arith.constant 0 : index
    %9 = vector.load %arg5[%c0_8, %c0_9] : memref<1x128xf32, #tpu.memory_space<vmem>>, vector<1x128xf32>
    %10 = vector.broadcast %9 : vector<1x128xf32> to vector<128x128xf32>
    %11 = arith.addf %8, %10 : vector<128x128xf32>
    %12 = math.tanh %11 : vector<128x128xf32>
    %c0_10 = arith.constant 0 : index
    %c0_11 = arith.constant 0 : index
    %13 = vector.load %arg6[%c0_10, %c0_11] : memref<128x128xf32, #tpu.memory_space<vmem>>, vector<128x128xf32>
    %cst_12 = arith.constant dense<0.000000e+00> : vector<128x128xf32>
    %14 = tpu.matmul %12, %13, %cst_12 {dimension_numbers = #tpu.dot_dimension_numbers<[1], [0], [0], [1], [0, 0, 1, 1], [], []>} : vector<128x128xf32>, vector<128x128xf32>, vector<128x128xf32> -> vector<128x128xf32>
    %c0_13 = arith.constant 0 : index
    %c0_14 = arith.constant 0 : index
    %15 = vector.load %arg7[%c0_13, %c0_14] : memref<1x128xf32, #tpu.memory_space<vmem>>, vector<1x128xf32>
    %16 = vector.broadcast %15 : vector<1x128xf32> to vector<128x128xf32>
    %17 = arith.addf %14, %16 : vector<128x128xf32>
    %18 = math.tanh %17 : vector<128x128xf32>
    %c0_15 = arith.constant 0 : index
    %c0_16 = arith.constant 0 : index
    %19 = vector.load %arg8[%c0_15, %c0_16] : memref<1x128xf32, #tpu.memory_space<vmem>>, vector<1x128xf32>
    %cst_17 = arith.constant dense<0.000000e+00> : vector<1x128xf32>
    %20 = tpu.matmul %19, %18, %cst_17 {dimension_numbers = #tpu.dot_dimension_numbers<[1], [1], [0], [0], [0, 0, 1, 0], [], []>} : vector<1x128xf32>, vector<128x128xf32>, vector<1x128xf32> -> vector<1x128xf32>
    %c0_18 = arith.constant 0 : index
    %21 = memref.load %arg9[%c0_18] : memref<1xf32, #tpu.memory_space<smem>>
    %22 = vector.broadcast %21 : f32 to vector<1x128xf32>
    %23 = arith.addf %20, %22 : vector<1x128xf32>
    %24 = vector.shape_cast %23 : vector<1x128xf32> to vector<1x128xf32>
    %25 = vector.broadcast %24 : vector<1x128xf32> to vector<8x128xf32>
    %c0_19 = arith.constant 0 : index
    %c0_20 = arith.constant 0 : index
    %26 = vector.load %arg10[%c0_19, %c0_20] : memref<8x128xf32, #tpu.memory_space<vmem>>, vector<8x128xf32>
    tpu.vector_store %arg10[%c0_19, %c0_20], %25 {strides = array<i32>} : memref<8x128xf32, #tpu.memory_space<vmem>>, vector<8x128xf32>,
    return
  }
  func.func @transform_0(%arg0: i32) -> (i32, i32) {
    %c0_i32 = arith.constant 0 : i32
    %c0_i32_0 = arith.constant 0 : i32
    return %arg0, %c0_i32 : i32, i32
  }
  func.func @transform_1(%arg0: i32) -> (i32, i32) {
    %c0_i32 = arith.constant 0 : i32
    %c0_i32_0 = arith.constant 0 : i32
    %c0_i32_1 = arith.constant 0 : i32
    return %c0_i32, %c0_i32_0 : i32, i32
  }
  func.func @transform_2(%arg0: i32) -> (i32, i32) {
    %c0_i32 = arith.constant 0 : i32
    %c0_i32_0 = arith.constant 0 : i32
    %c0_i32_1 = arith.constant 0 : i32
    return %c0_i32, %c0_i32_0 : i32, i32
  }
  func.func @transform_3(%arg0: i32) -> (i32, i32) {
    %c0_i32 = arith.constant 0 : i32
    %c0_i32_0 = arith.constant 0 : i32
    %c0_i32_1 = arith.constant 0 : i32
    return %c0_i32, %c0_i32_0 : i32, i32
  }
  func.func @transform_4(%arg0: i32) -> (i32, i32) {
    %c0_i32 = arith.constant 0 : i32
    %c0_i32_0 = arith.constant 0 : i32
    %c0_i32_1 = arith.constant 0 : i32
    return %c0_i32, %c0_i32_0 : i32, i32
  }
  func.func @transform_5(%arg0: i32) -> (i32, i32) {
    %c0_i32 = arith.constant 0 : i32
    %c0_i32_0 = arith.constant 0 : i32
    %c0_i32_1 = arith.constant 0 : i32
    return %c0_i32, %c0_i32_0 : i32, i32
  }
  func.func @transform_6(%arg0: i32) -> (i32, i32) {
    %c0_i32 = arith.constant 0 : i32
    %c0_i32_0 = arith.constant 0 : i32
    %c0_i32_1 = arith.constant 0 : i32
    return %c0_i32, %c0_i32_0 : i32, i32
  }
  func.func @transform_7(%arg0: i32) -> (i32, i32) {
    %c0_i32 = arith.constant 0 : i32
    %c0_i32_0 = arith.constant 0 : i32
    %c0_i32_1 = arith.constant 0 : i32
    return %c0_i32, %c0_i32_0 : i32, i32
  }
  func.func @transform_8(%arg0: i32) -> i32 {
    %c0_i32 = arith.constant 0 : i32
    %c0_i32_0 = arith.constant 0 : i32
    return %c0_i32 : i32
  }
  func.func @transform_9(%arg0: i32) -> (i32, i32) {
    %c0_i32 = arith.constant 0 : i32
    %c0_i32_0 = arith.constant 0 : i32
    return %c0_i32, %arg0 : i32, i32
  }
}

</mosaic_0001>

<bundles_post_ra>
// kernel: tpu_custom_call.1
= control target key start
LH: loop header
LB: loop body
LE: loop exit
PB: predicated region body
PF: predicated region fallthrough
CT: control target
= control target key end

     0   :  { %15 = vsyncpa [#allocation4], 0  ;;  %s853_s0 = inlined_call_operand.vmem [shape: f32[128,5], index: 0, kind: input, shape index: {}]   ;;  %s854_s1 = inlined_call_operand.vmem [shape: f32[8,128], index: 1, kind: input, shape index: {}]   ;;  %s855_s2 = inlined_call_operand.vmem [shape: f32[1,128], index: 2, kind: input, shape index: {}]   ;;  %s856_s3 = inlined_call_operand.vmem [shape: f32[128,128], index: 3, kind: input, shape index: {}]   ;;  %s857_s4 = inlined_call_operand.vmem [shape: f32[1,128], index: 4, kind: input, shape index: {}]   ;;  %s858_s5 = inlined_call_operand.hbm [shape: f32[128,128], index: 5, kind: input, shape index: {}]   ;;  %s859_s6 = inlined_call_operand.vmem [shape: f32[1,128], index: 6, kind: input, shape index: {}]   ;;  %s860_s7 = inlined_call_operand.vmem [shape: f32[1,128], index: 7, kind: input, shape index: {}]   ;;  %s861_s8 = inlined_call_operand.<no memory space> [shape: f32[1], index: 8, kind: input, shape index: {}]   ;;  %s862_s9 = inlined_call_operand.hbm [shape: f32[8,128], index: 9, kind: output, shape index: {}]  }
   0x1   :  { %16 = vsyncpa [#allocation5], 0  ;;  %s31_s11 = sshll.u32 %s858_s5, 4  ;;  %s621_s12 = smov [#allocation3]   ;;  %s32_s11 = int_to_ptr.hbm [resolvable:$true] %s31_s11 }
   0x2   :  { %s33_s13 = sshll.u32 %s621_s12, 4  ;;  %s622_s14 = smov 128   ;;  %s34_s13 = int_to_ptr.vmem [resolvable:$true] %s33_s13 }
   0x3   :  { %s623_s15 = smov 8  }
   0x4   :  { %39 = dma.hbm_to_vmem [thread:$0]  %s32_s11, 2048, %s34_s13, [#allocation4], %s622_s14, %s622_s14, %s623_s15  }
   0x5   :  { %617 = dma.done.wait [#allocation4], 2048  }
   0x6   :  { %618 = vsyncadd [#allocation4], 4294965248  ;;  %vm120_vm0 = vcmask 1044480   ;;  %vm71_vm1 = vcmask 39936   ;;  %v66_v0 = vld [vmem:[%s854_s1] sm:$0x1f] }
   0x7   :  { %v50_v1 = vld [vmem:[%s853_s0] sm:$0xff]  ;;  %449 = vmatpush.msk.msra.mxu0 %vm120_vm0, %v66_v0  ;;  %v51_v2 = vld [vmem:[%s853_s0 + $0x8] sm:$0xff]  ;;  %v52_v3 = vld [vmem:[%s853_s0 + $0x10] sm:$0xff]  ;;  %s624_s18 = smov [#allocation6]   ;;  %s439_s21 = sshll.u32 %s862_s9, 4  ;;  %s440_s21 = int_to_ptr.hbm [resolvable:$true] %s439_s21 }
   0x8   :  { %450 = vmatmul.msk.f32.vlgmr.msra.gmra.mxu0 %vm71_vm1, %v50_v1  ;;  %v53_v4 = vld [vmem:[%s853_s0 + $0x18] sm:$0xff]  ;;  %v54_v5 = vld [vmem:[%s853_s0 + $0x20] sm:$0xff]  ;;  %v55_v6 = vld [vmem:[%s853_s0 + $0x28] sm:$0xff]  ;;  %s437_s19 = sshll.u32 %s624_s18, 4  ;;  %s438_s19 = int_to_ptr.vmem [resolvable:$true] %s437_s19 }
   0x9   :  { %v56_v7 = vld [vmem:[%s853_s0 + $0x30] sm:$0xff]  ;;  %v57_v8 = vld [vmem:[%s853_s0 + $0x38] sm:$0xff]  ;;  %v58_v9 = vld [vmem:[%s853_s0 + $0x40] sm:$0xff] }
   0xa   :  { %v59_v10 = vld [vmem:[%s853_s0 + $0x48] sm:$0xff]  ;;  %v220_v11 = vld [vmem:[%s856_s3 + $0x78] sm:$0xff]  ;;  %v219_v12 = vld [vmem:[%s856_s3 + $0x70] sm:$0xff] }
   0xb   :  { %225 = vmatpush.msra.mxu1 %v220_v11  ;;  %v218_v13 = vld [vmem:[%s856_s3 + $0x68] sm:$0xff]  ;;  %v217_v14 = vld [vmem:[%s856_s3 + $0x60] sm:$0xff]  ;;  %v60_v15 = vld [vmem:[%s853_s0 + $0x50] sm:$0xff] }
   0xc   :  { %v216_v16 = vld [vmem:[%s856_s3 + $0x58] sm:$0xff]  ;;  %v215_v17 = vld [vmem:[%s856_s3 + $0x50] sm:$0xff]  ;;  %v214_v18 = vld [vmem:[%s856_s3 + $0x48] sm:$0xff] }
   0xd   :  { %226 = vmatpush.msra.mxu1 %v219_v12  ;;  %v213_v19 = vld [vmem:[%s856_s3 + $0x40] sm:$0xff]  ;;  %v61_v20 = vld [vmem:[%s853_s0 + $0x58] sm:$0xff]  ;;  %v211_v22 = vld [vmem:[%s856_s3 + $0x30] sm:$0xff] }
   0xe   :  { %v212_v21 = vld [vmem:[%s856_s3 + $0x38] sm:$0xff]  ;;  %v210_v23 = vld [vmem:[%s856_s3 + $0x28] sm:$0xff]  ;;  %v62_v24 = vld [vmem:[%s853_s0 + $0x60] sm:$0xff] }
   0xf   :  { %227 = vmatpush.msra.mxu1 %v218_v13  ;;  %v209_v25 = vld [vmem:[%s856_s3 + $0x20] sm:$0xff]  ;;  %v208_v26 = vld [vmem:[%s856_s3 + $0x18] sm:$0xff]  ;;  %v207_v27 = vld [vmem:[%s856_s3 + $0x10] sm:$0xff] }
  0x10   :  { %451 = vmatmul.msk.f32.gmra.mxu0 %vm71_vm1, %v51_v2  ;;  %v206_v28 = vld [vmem:[%s856_s3 + $0x8] sm:$0xff]  ;;  %v205_v30 = vld [vmem:[%s856_s3] sm:$0xff]  ;;  %v64_v31 = vld [vmem:[%s853_s0 + $0x70] sm:$0xff] }
  0x11   :  { %228 = vmatpush.msra.mxu1 %v217_v14  ;;  %v63_v29 = vld [vmem:[%s853_s0 + $0x68] sm:$0xff]  ;;  %v65_v32 = vld [vmem:[%s853_s0 + $0x78] sm:$0xff]  ;;  %v796_v33 = vld [vmem:[%s855_s2] ss:$0 sm:$0xff] }
  0x12   :  { %v321_v2 = vld [vmem:[#allocation3 + $0x78] sm:$0xff]  ;;  %v315_v11 = vld [vmem:[#allocation3 + $0x48] sm:$0xff]  ;;  %v314_v12 = vld [vmem:[#allocation3 + $0x40] sm:$0xff] }
  0x13   :  { %229 = vmatpush.msra.mxu1 %v216_v16  ;;  %326 = vmatpush.msra.mxu2 %v321_v2  ;;  %v313_v16 = vld [vmem:[#allocation3 + $0x38] sm:$0xff] }
  0x15   :  { %230 = vmatpush.msra.mxu1 %v215_v17  ;;  %v312_v17 = vld [vmem:[#allocation3 + $0x30] sm:$0xff] }
  0x17   :  { %231 = vmatpush.msra.mxu1 %v214_v18  ;;  %v311_v18 = vld [vmem:[#allocation3 + $0x28] sm:$0xff] }
  0x18   :  { %452 = vmatmul.msk.f32.gmra.mxu0 %vm71_vm1, %v52_v3  ;;  %v320_v3 = vld [vmem:[#allocation3 + $0x70] sm:$0xff] }
  0x19   :  { %232 = vmatpush.msra.mxu1 %v213_v19  ;;  %327 = vmatpush.msra.mxu2 %v320_v3  ;;  %v310_v19 = vld [vmem:[#allocation3 + $0x20] sm:$0xff] }
  0x1b   :  { %233 = vmatpush.msra.mxu1 %v212_v21 }
  0x1d   :  { %234 = vmatpush.msra.mxu1 %v211_v22 }
  0x1f   :  { %235 = vmatpush.msra.mxu1 %v210_v23  ;;  %v309_v23 = vld [vmem:[#allocation3 + $0x18] sm:$0xff] }
  0x20   :  { %453 = vmatmul.msk.f32.gmra.mxu0 %vm71_vm1, %v53_v4  ;;  %v319_v4 = vld [vmem:[#allocation3 + $0x68] sm:$0xff] }
  0x21   :  { %236 = vmatpush.msra.mxu1 %v209_v25  ;;  %328 = vmatpush.msra.mxu2 %v319_v4  ;;  %v307_v25 = vld [vmem:[#allocation3 + $0x8] sm:$0xff] }
  0x23   :  { %237 = vmatpush.msra.mxu1 %v208_v26  ;;  %v306_v26 = vld [vmem:[#allocation3] sm:$0xff] }
  0x25   :  { %238 = vmatpush.msra.mxu1 %v207_v27 }
  0x27   :  { %239 = vmatpush.msra.mxu1 %v206_v28 }
  0x28   :  { %454 = vmatmul.msk.f32.gmra.mxu0 %vm71_vm1, %v54_v5  ;;  %v318_v5 = vld [vmem:[#allocation3 + $0x60] sm:$0xff] }
  0x29   :  { %240 = vmatpush.msra.mxu1 %v205_v30  ;;  %329 = vmatpush.msra.mxu2 %v318_v5 }
  0x30   :  { %455 = vmatmul.msk.f32.gmra.mxu0 %vm71_vm1, %v55_v6 }
  0x38   :  { %456 = vmatmul.msk.f32.gmra.mxu0 %vm71_vm1, %v56_v7 }
  0x40   :  { %457 = vmatmul.msk.f32.gmra.mxu0 %vm71_vm1, %v57_v8 }
  0x48   :  { %458 = vmatmul.msk.f32.gmra.mxu0 %vm71_vm1, %v58_v9  ;;  %v317_v9 = vld [vmem:[#allocation3 + $0x58] sm:$0xff] }
  0x49   :  { %330 = vmatpush.msra.mxu2 %v317_v9 }
  0x50   :  { %459 = vmatmul.msk.f32.gmra.mxu0 %vm71_vm1, %v59_v10  ;;  %v316_v10 = vld [vmem:[#allocation3 + $0x50] sm:$0xff] }
  0x51   :  { %331 = vmatpush.msra.mxu2 %v316_v10 }
  0x53   :  { %332 = vmatpush.msra.mxu2 %v315_v11 }
  0x55   :  { %333 = vmatpush.msra.mxu2 %v314_v12 }
  0x57   :  { %334 = vmatpush.msra.mxu2 %v313_v16 }
  0x58   :  { %460 = vmatmul.msk.f32.gmra.mxu0 %vm71_vm1, %v60_v15 }
  0x59   :  { %335 = vmatpush.msra.mxu2 %v312_v17 }
  0x5b   :  { %336 = vmatpush.msra.mxu2 %v311_v18 }
  0x5d   :  { %337 = vmatpush.msra.mxu2 %v310_v19 }
  0x5f   :  { %338 = vmatpush.msra.mxu2 %v309_v23 }
  0x60   :  { %461 = vmatmul.msk.f32.gmra.mxu0 %vm71_vm1, %v61_v20 }
  0x68   :  { %462 = vmatmul.msk.f32.gmra.mxu0 %vm71_vm1, %v62_v24  ;;  %v308_v24 = vld [vmem:[#allocation3 + $0x10] sm:$0xff] }
  0x69   :  { %339 = vmatpush.msra.mxu2 %v308_v24 }
  0x6b   :  { %340 = vmatpush.msra.mxu2 %v307_v25 }
  0x6d   :  { %341 = vmatpush.msra.mxu2 %v306_v26 }
  0x70   :  { %463 = vmatmul.msk.f32.gmra.mxu0 %vm71_vm1, %v63_v29 }
  0x78   :  { %464 = vmatmul.msk.f32.gmra.mxu0 %vm71_vm1, %v64_v31 }
  0x80   :  { %465 = vmatmul.msk.f32.gmra.mxu0 %vm71_vm1, %v65_v32 }
  0x85   :  { %v141_v34 = vpop.f32.mrf.mxu0 }
  0x86   :  { %v142_v35 = vadd.f32 %v796_v33, %v141_v34 }
  0x88   :  { %473 = vtanh.f32 %v142_v35  ;;  %v817_v35 = vld [vmem:[%s857_s4] ss:$0 sm:$0xff] }
  0x8d   :  { %v144_v36 = vpop.f32.mrf.mxu0 }
  0x8e   :  { %v474_v37 = vpop.eup %473  ;;  %v145_v38 = vadd.f32 %v796_v33, %v144_v36 }
  0x8f   :  { %241 = vmatmul.f32.vlgmr.msra.gmra.mxu1 %v474_v37 }
  0x90   :  { %475 = vtanh.f32 %v145_v38 }
  0x95   :  { %v147_v39 = vpop.f32.mrf.mxu0 }
  0x96   :  { %v476_v40 = vpop.eup %475  ;;  %v148_v41 = vadd.f32 %v796_v33, %v147_v39 }
  0x97   :  { %244 = vmatmul.f32.gmra.mxu1 %v476_v40 }
  0x98   :  { %477 = vtanh.f32 %v148_v41 }
  0x9d   :  { %v150_v42 = vpop.f32.mrf.mxu0 }
  0x9e   :  { %v478_v43 = vpop.eup %477  ;;  %v151_v44 = vadd.f32 %v796_v33, %v150_v42 }
  0x9f   :  { %247 = vmatmul.f32.gmra.mxu1 %v478_v43 }
  0xa0   :  { %479 = vtanh.f32 %v151_v44 }
  0xa5   :  { %v153_v45 = vpop.f32.mrf.mxu0 }
  0xa6   :  { %v480_v46 = vpop.eup %479  ;;  %v154_v47 = vadd.f32 %v796_v33, %v153_v45 }
  0xa7   :  { %250 = vmatmul.f32.gmra.mxu1 %v480_v46 }
  0xa8   :  { %481 = vtanh.f32 %v154_v47 }
  0xad   :  { %v156_v48 = vpop.f32.mrf.mxu0 }
  0xae   :  { %v482_v49 = vpop.eup %481  ;;  %v157_v50 = vadd.f32 %v796_v33, %v156_v48 }
  0xaf   :  { %253 = vmatmul.f32.gmra.mxu1 %v482_v49 }
  0xb0   :  { %483 = vtanh.f32 %v157_v50 }
  0xb5   :  { %v159_v51 = vpop.f32.mrf.mxu0 }
  0xb6   :  { %v484_v52 = vpop.eup %483  ;;  %v160_v53 = vadd.f32 %v796_v33, %v159_v51 }
  0xb7   :  { %256 = vmatmul.f32.gmra.mxu1 %v484_v52 }
  0xb8   :  { %485 = vtanh.f32 %v160_v53 }
  0xbd   :  { %v162_v54 = vpop.f32.mrf.mxu0 }
  0xbe   :  { %v486_v55 = vpop.eup %485  ;;  %v163_v56 = vadd.f32 %v796_v33, %v162_v54 }
  0xbf   :  { %259 = vmatmul.f32.gmra.mxu1 %v486_v55 }
  0xc0   :  { %487 = vtanh.f32 %v163_v56 }
  0xc5   :  { %v165_v57 = vpop.f32.mrf.mxu0 }
  0xc6   :  { %v488_v58 = vpop.eup %487  ;;  %v166_v59 = vadd.f32 %v796_v33, %v165_v57 }
  0xc7   :  { %262 = vmatmul.f32.gmra.mxu1 %v488_v58 }
  0xc8   :  { %489 = vtanh.f32 %v166_v59 }
  0xcd   :  { %v168_v60 = vpop.f32.mrf.mxu0 }
  0xce   :  { %v490_v61 = vpop.eup %489  ;;  %v169_v62 = vadd.f32 %v796_v33, %v168_v60 }
  0xcf   :  { %265 = vmatmul.f32.gmra.mxu1 %v490_v61 }
  0xd0   :  { %491 = vtanh.f32 %v169_v62 }
  0xd5   :  { %v171_v63 = vpop.f32.mrf.mxu0 }
  0xd6   :  { %v492_v0 = vpop.eup %491  ;;  %v172_v1 = vadd.f32 %v796_v33, %v171_v63 }
  0xd7   :  { %268 = vmatmul.f32.gmra.mxu1 %v492_v0 }
  0xd8   :  { %493 = vtanh.f32 %v172_v1 }
  0xdd   :  { %v174_v6 = vpop.f32.mrf.mxu0 }
  0xde   :  { %v494_v7 = vpop.eup %493  ;;  %v175_v8 = vadd.f32 %v796_v33, %v174_v6 }
  0xdf   :  { %271 = vmatmul.f32.gmra.mxu1 %v494_v7 }
  0xe0   :  { %495 = vtanh.f32 %v175_v8 }
  0xe5   :  { %v177_v13 = vpop.f32.mrf.mxu0 }
  0xe6   :  { %v496_v14 = vpop.eup %495  ;;  %v178_v15 = vadd.f32 %v796_v33, %v177_v13 }
  0xe7   :  { %274 = vmatmul.f32.gmra.mxu1 %v496_v14 }
  0xe8   :  { %497 = vtanh.f32 %v178_v15 }
  0xed   :  { %v180_v20 = vpop.f32.mrf.mxu0 }
  0xee   :  { %v498_v21 = vpop.eup %497  ;;  %v181_v22 = vadd.f32 %v796_v33, %v180_v20 }
  0xef   :  { %277 = vmatmul.f32.gmra.mxu1 %v498_v21 }
  0xf0   :  { %499 = vtanh.f32 %v181_v22 }
  0xf5   :  { %v183_v27 = vpop.f32.mrf.mxu0 }
  0xf6   :  { %v500_v28 = vpop.eup %499  ;;  %v184_v29 = vadd.f32 %v796_v33, %v183_v27 }
  0xf7   :  { %280 = vmatmul.f32.gmra.mxu1 %v500_v28 }
  0xf8   :  { %501 = vtanh.f32 %v184_v29 }
  0xfd   :  { %v186_v30 = vpop.f32.mrf.mxu0 }
  0xfe   :  { %v502_v31 = vpop.eup %501  ;;  %v187_v32 = vadd.f32 %v796_v33, %v186_v30 }
  0xff   :  { %283 = vmatmul.f32.gmra.mxu1 %v502_v31 }
 0x100   :  { %503 = vtanh.f32 %v187_v32 }
 0x106   :  { %v504_v34 = vpop.eup %503 }
 0x107   :  { %286 = vmatmul.f32.gmra.mxu1 %v504_v34 }
 0x10c   :  { %v242_v36 = vpop.f32.mrf.mxu1 }
 0x10d   :  { %v243_v37 = vadd.f32 %v817_v35, %v242_v36 }
 0x10f   :  { %505 = vtanh.f32 %v243_v37 }
 0x114   :  { %v245_v38 = vpop.f32.mrf.mxu1 }
 0x115   :  { %v506_v39 = vpop.eup %505  ;;  %v246_v40 = vadd.f32 %v817_v35, %v245_v38 }
 0x116   :  { %342 = vmatmul.f32.vlgmr.msra.gmra.mxu2 %v506_v39 }
 0x117   :  { %507 = vtanh.f32 %v246_v40 }
 0x11c   :  { %v248_v33 = vpop.f32.mrf.mxu1 }
 0x11d   :  { %v508_v41 = vpop.eup %507  ;;  %v249_v42 = vadd.f32 %v817_v35, %v248_v33 }
 0x11e   :  { %345 = vmatmul.f32.gmra.mxu2 %v508_v41 }
 0x11f   :  { %509 = vtanh.f32 %v249_v42 }
 0x124   :  { %v251_v43 = vpop.f32.mrf.mxu1 }
 0x125   :  { %v510_v44 = vpop.eup %509  ;;  %v252_v45 = vadd.f32 %v817_v35, %v251_v43 }
 0x126   :  { %348 = vmatmul.f32.gmra.mxu2 %v510_v44 }
 0x127   :  { %511 = vtanh.f32 %v252_v45 }
 0x12c   :  { %v254_v46 = vpop.f32.mrf.mxu1 }
 0x12d   :  { %v512_v47 = vpop.eup %511  ;;  %v255_v48 = vadd.f32 %v817_v35, %v254_v46 }
 0x12e   :  { %351 = vmatmul.f32.gmra.mxu2 %v512_v47 }
 0x12f   :  { %513 = vtanh.f32 %v255_v48 }
 0x134   :  { %v257_v49 = vpop.f32.mrf.mxu1 }
 0x135   :  { %v514_v50 = vpop.eup %513  ;;  %v258_v51 = vadd.f32 %v817_v35, %v257_v49 }
 0x136   :  { %354 = vmatmul.f32.gmra.mxu2 %v514_v50 }
 0x137   :  { %515 = vtanh.f32 %v258_v51 }
 0x13c   :  { %v260_v52 = vpop.f32.mrf.mxu1 }
 0x13d   :  { %v516_v53 = vpop.eup %515  ;;  %v261_v54 = vadd.f32 %v817_v35, %v260_v52 }
 0x13e   :  { %357 = vmatmul.f32.gmra.mxu2 %v516_v53 }
 0x13f   :  { %517 = vtanh.f32 %v261_v54 }
 0x144   :  { %v263_v55 = vpop.f32.mrf.mxu1 }
 0x145   :  { %v518_v56 = vpop.eup %517  ;;  %v264_v57 = vadd.f32 %v817_v35, %v263_v55 }
 0x146   :  { %360 = vmatmul.f32.gmra.mxu2 %v518_v56 }
 0x147   :  { %519 = vtanh.f32 %v264_v57 }
 0x14c   :  { %v266_v58 = vpop.f32.mrf.mxu1 }
 0x14d   :  { %v520_v59 = vpop.eup %519  ;;  %v267_v60 = vadd.f32 %v817_v35, %v266_v58 }
 0x14e   :  { %363 = vmatmul.f32.gmra.mxu2 %v520_v59 }
 0x14f   :  { %521 = vtanh.f32 %v267_v60 }
 0x154   :  { %v269_v61 = vpop.f32.mrf.mxu1 }
 0x155   :  { %v522_v62 = vpop.eup %521  ;;  %v270_v63 = vadd.f32 %v817_v35, %v269_v61 }
 0x156   :  { %366 = vmatmul.f32.gmra.mxu2 %v522_v62 }
 0x157   :  { %523 = vtanh.f32 %v270_v63 }
 0x15c   :  { %v272_v0 = vpop.f32.mrf.mxu1 }
 0x15d   :  { %v524_v1 = vpop.eup %523  ;;  %v273_v2 = vadd.f32 %v817_v35, %v272_v0 }
 0x15e   :  { %369 = vmatmul.f32.gmra.mxu2 %v524_v1 }
 0x15f   :  { %525 = vtanh.f32 %v273_v2 }
 0x164   :  { %v275_v3 = vpop.f32.mrf.mxu1 }
 0x165   :  { %v526_v4 = vpop.eup %525  ;;  %v276_v5 = vadd.f32 %v817_v35, %v275_v3 }
 0x166   :  { %372 = vmatmul.f32.gmra.mxu2 %v526_v4  ;;  %v407_v4 = vld [vmem:[%s860_s7] sm:$0x1] }
 0x167   :  { %527 = vtanh.f32 %v276_v5  ;;  %v409_v5 = vstv %s861_s8 }
 0x16c   :  { %v278_v6 = vpop.f32.mrf.mxu1 }
 0x16d   :  { %v528_v7 = vpop.eup %527  ;;  %v279_v8 = vadd.f32 %v817_v35, %v278_v6 }
 0x16e   :  { %375 = vmatmul.f32.gmra.mxu2 %v528_v7 }
 0x16f   :  { %529 = vtanh.f32 %v279_v8 }
 0x174   :  { %v281_v9 = vpop.f32.mrf.mxu1 }
 0x175   :  { %v530_v10 = vpop.eup %529  ;;  %v282_v11 = vadd.f32 %v817_v35, %v281_v9 }
 0x176   :  { %378 = vmatmul.f32.gmra.mxu2 %v530_v10 }
 0x177   :  { %531 = vtanh.f32 %v282_v11 }
 0x17c   :  { %v284_v12 = vpop.f32.mrf.mxu1 }
 0x17d   :  { %v532_v13 = vpop.eup %531  ;;  %v285_v14 = vadd.f32 %v817_v35, %v284_v12 }
 0x17e   :  { %381 = vmatmul.f32.gmra.mxu2 %v532_v13 }
 0x17f   :  { %533 = vtanh.f32 %v285_v14 }
 0x184   :  { %v287_v15 = vpop.f32.mrf.mxu1 }
 0x185   :  { %v534_v16 = vpop.eup %533  ;;  %v288_v17 = vadd.f32 %v817_v35, %v287_v15  ;;  %v472_v35 = vld [vmem:[%s859_s6] ss:$0 sm:$0xff] }
 0x186   :  { %384 = vmatmul.f32.gmra.mxu2 %v534_v16 }
 0x187   :  { %535 = vtanh.f32 %v288_v17 }
 0x18d   :  { %v536_v18 = vpop.eup %535 }
 0x18e   :  { %387 = vmatmul.f32.gmra.mxu2 %v536_v18 }
 0x199   :  { %v835_v19 = vpop.f32.mrf.mxu2 }
 0x19a   :  { %v344_v0 = vadd.f32 %v472_v35, %v835_v19 }
 0x1a1   :  { %v837_v20 = vpop.f32.mrf.mxu2 }
 0x1a2   :  { %v347_v62 = vadd.f32 %v472_v35, %v837_v20 }
 0x1a9   :  { %v349_v21 = vpop.f32.mrf.mxu2 }
 0x1aa   :  { %v350_v60 = vadd.f32 %v472_v35, %v349_v21 }
 0x1b1   :  { %v352_v22 = vpop.f32.mrf.mxu2 }
 0x1b2   :  { %v353_v58 = vadd.f32 %v472_v35, %v352_v22 }
 0x1b9   :  { %v355_v23 = vpop.f32.mrf.mxu2 }
 0x1ba   :  { %v356_v56 = vadd.f32 %v472_v35, %v355_v23 }
 0x1c1   :  { %v358_v24 = vpop.f32.mrf.mxu2 }
 0x1c2   :  { %v359_v54 = vadd.f32 %v472_v35, %v358_v24 }
 0x1c9   :  { %v361_v25 = vpop.f32.mrf.mxu2 }
 0x1ca   :  { %v362_v52 = vadd.f32 %v472_v35, %v361_v25 }
 0x1d1   :  { %v364_v26 = vpop.f32.mrf.mxu2 }
 0x1d2   :  { %v365_v50 = vadd.f32 %v472_v35, %v364_v26 }
 0x1d9   :  { %v367_v27 = vpop.f32.mrf.mxu2 }
 0x1da   :  { %v368_v48 = vadd.f32 %v472_v35, %v367_v27 }
 0x1e1   :  { %v370_v28 = vpop.f32.mrf.mxu2 }
 0x1e2   :  { %v371_v46 = vadd.f32 %v472_v35, %v370_v28 }
 0x1e9   :  { %v373_v29 = vpop.f32.mrf.mxu2 }
 0x1ea   :  { %v374_v44 = vadd.f32 %v472_v35, %v373_v29 }
 0x1f1   :  { %v376_v30 = vpop.f32.mrf.mxu2 }
 0x1f2   :  { %v377_v42 = vadd.f32 %v472_v35, %v376_v30 }
 0x1f9   :  { %v379_v31 = vpop.f32.mrf.mxu2 }
 0x1fa   :  { %v380_v33 = vadd.f32 %v472_v35, %v379_v31 }
 0x201   :  { %v382_v32 = vpop.f32.mrf.mxu2 }
 0x202   :  { %v383_v39 = vadd.f32 %v472_v35, %v382_v32 }
 0x209   :  { %v385_v34 = vpop.f32.mrf.mxu2 }
 0x20a   :  { %v386_v38 = vadd.f32 %v472_v35, %v385_v34 }
 0x211   :  { %v388_v36 = vpop.f32.mrf.mxu2 }
 0x212   :  { %v389_v37 = vadd.f32 %v472_v35, %v388_v36 }
 0x214   :  { %537 = vtanh.f32 %v389_v37 }
 0x215   :  { %539 = vtanh.f32 %v386_v38 }
 0x216   :  { %541 = vtanh.f32 %v383_v39 }
 0x217   :  { %543 = vtanh.f32 %v380_v33 }
 0x218   :  { %545 = vtanh.f32 %v377_v42 }
 0x219   :  { %547 = vtanh.f32 %v374_v44 }
 0x21a   :  { %v538_v40 = vpop.eup %537  ;;  %549 = vtanh.f32 %v371_v46 }
 0x21b   :  { %410 = vmatpush.xpose.msra.mxu3 %v538_v40  ;;  %v540_v41 = vpop.eup %539  ;;  %551 = vtanh.f32 %v368_v48 }
 0x21c   :  { %v542_v43 = vpop.eup %541  ;;  %553 = vtanh.f32 %v365_v50 }
 0x21d   :  { %v544_v45 = vpop.eup %543  ;;  %555 = vtanh.f32 %v362_v52 }
 0x21e   :  { %v546_v47 = vpop.eup %545  ;;  %557 = vtanh.f32 %v359_v54 }
 0x21f   :  { %411 = vmatpush.xpose.msra.mxu3 %v540_v41  ;;  %v548_v49 = vpop.eup %547  ;;  %559 = vtanh.f32 %v356_v56 }
 0x220   :  { %v550_v51 = vpop.eup %549  ;;  %561 = vtanh.f32 %v353_v58 }
 0x221   :  { %v552_v53 = vpop.eup %551  ;;  %563 = vtanh.f32 %v350_v60 }
 0x222   :  { %v554_v55 = vpop.eup %553  ;;  %565 = vtanh.f32 %v347_v62 }
 0x223   :  { %412 = vmatpush.xpose.msra.mxu3 %v542_v43  ;;  %v556_v57 = vpop.eup %555  ;;  %567 = vtanh.f32 %v344_v0 }
 0x224   :  { %v558_v59 = vpop.eup %557 }
 0x225   :  { %v560_v61 = vpop.eup %559 }
 0x226   :  { %v562_v63 = vpop.eup %561 }
 0x227   :  { %413 = vmatpush.xpose.msra.mxu3 %v544_v45  ;;  %v564_v1 = vpop.eup %563 }
 0x228   :  { %v566_v2 = vpop.eup %565 }
 0x229   :  { %v568_v3 = vpop.eup %567 }
 0x22b   :  { %414 = vmatpush.xpose.msra.mxu3 %v546_v47 }
 0x22f   :  { %415 = vmatpush.xpose.msra.mxu3 %v548_v49 }
 0x233   :  { %416 = vmatpush.xpose.msra.mxu3 %v550_v51 }
 0x237   :  { %417 = vmatpush.xpose.msra.mxu3 %v552_v53 }
 0x23b   :  { %418 = vmatpush.xpose.msra.mxu3 %v554_v55 }
 0x23f   :  { %419 = vmatpush.xpose.msra.mxu3 %v556_v57 }
 0x243   :  { %420 = vmatpush.xpose.msra.mxu3 %v558_v59 }
 0x247   :  { %421 = vmatpush.xpose.msra.mxu3 %v560_v61 }
 0x24b   :  { %422 = vmatpush.xpose.msra.mxu3 %v562_v63 }
 0x24f   :  { %423 = vmatpush.xpose.msra.mxu3 %v564_v1 }
 0x253   :  { %424 = vmatpush.xpose.msra.mxu3 %v566_v2 }
 0x257   :  { %425 = vmatpush.xpose.msra.mxu3 %v568_v3 }
 0x25a   :  { %426 = vmatmul.f32.vlgmr.msra.gmra.mxu3 %v407_v4 }
 0x2dd   :  { %v427_v6 = vpop.f32.mrf.mxu3 }
 0x2de   :  { %v428_v7 = vadd.f32 %v427_v6, %v409_v5 }
 0x2e0   :  { %v430_v8 = vperm.slane %v428_v7, 0 }
 0x2e2   :  { %431 = vst [vmem:[#allocation6] sm:$0xff] %v430_v8 }
 0x2e3   :  { %442 = dma.vmem_to_hbm [thread:$0]  %s438_s19, 128, %s440_s21, [#allocation5]  }
 0x2e4   :  { %619 = dma.done.wait [#allocation5], 128  }
 0x2e5   :  { %620 = vsyncadd [#allocation5], 4294967168 }
 0x2e6   :  { %447 = vsyncpa [#allocation4], 1 }
 0x2e7   :  { %448 = vsyncpa [#allocation5], 1 }

</bundles_post_ra>
